<compile_context>
chip_gen: v7x
topology: tpu7x:2x2x1
jax: 0.10.0
libtpu: 0.0.40
codegen_flags: <defaults>
</compile_context>

<pallas_src>
import jax
import jax.numpy as jnp
from jax.experimental import pallas as pl
from jax.experimental.pallas import tpu as pltpu

LANE = 128        # vreg lane width
SUBLANE = 8       # vreg sublane count (32-bit)
_MiB = 1024 * 1024
_SMALL_BYTES = 2 * _MiB   # below this, per-step overhead dominates -> few steps


def _device_tuning():
    """(block_bytes, vmem_limit_bytes, min_grid_steps) per TPU generation."""
    kind = ""
    try:
        kind = jax.devices()[0].device_kind.lower()
    except Exception:
        pass
    if "7" in kind:
        # v7x: 3.2 TB/s HBM per TC, 64 MiB physical VMEM, 2 TCs share the grid.
        return 8 * _MiB, 40 * _MiB, 8
    # v5e / v5p / v6e: ~1-2 MiB blocks already hit the HBM-roofline plateau;
    # keep well inside the 16 MiB (v5e) scoped-VMEM default, set limit explicitly.
    return 2 * _MiB, 24 * _MiB, 4


def _round_up(a, b):
    return ((a + b - 1) // b) * b


def _choose_tile_rows(rows, lane_w, itemsize, block_bytes, min_steps):
    """Pick a row-tile: <= block_bytes per block, >= min_steps grid steps for
    DMA overlap + balanced two-TC split, aligned to the sublane packing."""
    row_align = SUBLANE * max(1, 4 // itemsize)     # 8 for f32, 16 for bf16, ...
    if rows <= row_align:
        return rows                                  # single full-extent block
    bytes_per_row = lane_w * itemsize
    total_bytes = rows * bytes_per_row
    # 1) VMEM byte budget cap (aligned down).
    cap = max(row_align, (block_bytes // bytes_per_row // row_align) * row_align)
    # 2) enough (and balanced) grid steps for pipeline overlap / megacore split.
    steps = min_steps if total_bytes > _SMALL_BYTES else 2
    balanced = _round_up(pl.cdiv(rows, steps), row_align)
    tile_rows = max(row_align, min(cap, balanced))
    return min(tile_rows, rows)


def _sigmoid_math_f32(x, alpha, c, out_dtype):
    """Exact logistic in f32, cast back to out_dtype (used for tiny tails)."""
    z = jnp.asarray(alpha, jnp.float32) * (x.astype(jnp.float32)
                                           - jnp.asarray(c, jnp.float32))
    return (1.0 / (1.0 + jnp.exp(-z))).astype(out_dtype)


def _sigmoid_kernel_smem(params_ref, x_ref, o_ref):
    # params_ref lives in SMEM: [alpha, c] (f32 scalars), for traced parameters.
    alpha = params_ref[0]
    c = params_ref[1]
    x = x_ref[...].astype(jnp.float32)
    o_ref[...] = (1.0 / (1.0 + jnp.exp(-alpha * (x - c)))).astype(o_ref.dtype)


def _make_static_kernel(alpha, c):
    # alpha/c are static Python floats -> bake as compile-time constants.
    alpha = float(alpha)
    c = float(c)

    def kernel(x_ref, o_ref):
        x = x_ref[...].astype(jnp.float32)
        o_ref[...] = (1.0 / (1.0 + jnp.exp(-alpha * (x - c)))).astype(o_ref.dtype)

    return kernel


def sigmoid_memb(x, alpha, c):
    """Elementwise sigmoid membership function via a Pallas TPU kernel.

    x: any-shaped float array. alpha, c: scalar parameters (Python floats or
    traced jax scalars, matching the learnable torch parameters).
    """
    orig_shape = x.shape
    dtype = x.dtype
    itemsize = jnp.dtype(dtype).itemsize

    xf = x.reshape(-1)
    n = xf.shape[0]
    if n == 0:
        return x

    static_params = (isinstance(alpha, (int, float)) and not isinstance(alpha, bool)
                     and isinstance(c, (int, float)) and not isinstance(c, bool))

    rem = n % LANE
    n_main = n - rem
    if n_main == 0:
        # Fewer than 128 elements: a kernel launch is pure overhead.
        return _sigmoid_math_f32(xf, alpha, c, dtype).reshape(orig_shape)

    # Zero-copy 128-aligned prefix (no pad/slice HBM round-trip).
    x_main = xf[:n_main] if rem else xf

    # Widest lane dimension (multiple of 128) that divides the aligned length.
    for lane_w in (4096, 2048, 1024, 512, 256, 128):
        if n_main % lane_w == 0:
            break
    rows = n_main // lane_w
    x2d = x_main.reshape(rows, lane_w)

    block_bytes, vmem_limit, min_steps = _device_tuning()
    tile_rows = _choose_tile_rows(rows, lane_w, itemsize, block_bytes, min_steps)
    grid = (pl.cdiv(rows, tile_rows),)

    x_spec = pl.BlockSpec((tile_rows, lane_w), lambda i: (i, 0))
    o_spec = pl.BlockSpec((tile_rows, lane_w), lambda i: (i, 0))
    cparams = pltpu.CompilerParams(
        dimension_semantics=("parallel",),
        vmem_limit_bytes=vmem_limit,
    )

    if static_params:
        out2d = pl.pallas_call(
            _make_static_kernel(alpha, c),
            out_shape=jax.ShapeDtypeStruct((rows, lane_w), dtype),
            grid=grid,
            in_specs=[x_spec],
            out_specs=o_spec,
            compiler_params=cparams,
        )(x2d)
    else:
        params = jnp.stack([jnp.asarray(alpha, jnp.float32).reshape(()),
                            jnp.asarray(c, jnp.float32).reshape(())])
        out2d = pl.pallas_call(
            _sigmoid_kernel_smem,
            out_shape=jax.ShapeDtypeStruct((rows, lane_w), dtype),
            grid=grid,
            in_specs=[pl.BlockSpec(memory_space=pltpu.MemorySpace.SMEM), x_spec],
            out_specs=o_spec,
            compiler_params=cparams,
        )(params, x2d)

    out = out2d.reshape(-1)
    if rem:
        tail = _sigmoid_math_f32(xf[n_main:], alpha, c, dtype)
        out = jnp.concatenate([out, tail])
    return out.reshape(orig_shape)


if __name__ == "__main__":
    key = jax.random.PRNGKey(0)
    alpha = 1.5
    c = 0.25

    # Small NCHW input consistent with the module's elementwise forward.
    x = jax.random.normal(key, (2, 4, 16, 16), dtype=jnp.float32)
    ref = jax.nn.sigmoid(alpha * (x - c))

    # 1) Static (Python float) parameters -> constants baked into the kernel.
    out = jax.block_until_ready(sigmoid_memb(x, alpha, c))
    assert out.shape == x.shape and out.dtype == x.dtype
    assert jnp.max(jnp.abs(out - ref)) < 1e-5

    # 2) Traced (learnable-style) parameters -> SMEM scalar path.
    out_t = jax.block_until_ready(
        sigmoid_memb(x, jnp.float32(alpha), jnp.float32(c)))
    assert jnp.max(jnp.abs(out_t - ref)) < 1e-5

    # 3) Non-128-aligned length -> aligned-prefix kernel + plain-JAX tail.
    xu = jax.random.normal(jax.random.PRNGKey(1), (2, 3, 37), dtype=jnp.float32)
    out_u = jax.block_until_ready(sigmoid_memb(xu, alpha, c))
    ref_u = jax.nn.sigmoid(alpha * (xu - c))
    assert out_u.shape == xu.shape
    assert jnp.max(jnp.abs(out_u - ref_u)) < 1e-5

    print("KERNEL_OK")
</pallas_src>

<mosaic_0001>
module attributes {stable_mosaic.version = 11 : i64} {
  func.func @kernel(%arg0: i32, %arg1: memref<1x2048xf32, #tpu.memory_space<vmem>>, %arg2: memref<1x2048xf32, #tpu.memory_space<vmem>>) attributes {dimension_semantics = [#tpu.dimension_semantics<parallel>], iteration_bounds = array<i64: 1>, scalar_prefetch = 0 : i64, scratch_operands = 0 : i64, tpu.core_type = #tpu.core_type<tc>, window_params = [{transform_indices = @transform_0, window_bounds = array<i64: 1, 2048>}, {transform_indices = @transform_1, window_bounds = array<i64: 1, 2048>}]} {
    %c0 = arith.constant 0 : index
    %c0_0 = arith.constant 0 : index
    %0 = vector.load %arg1[%c0, %c0_0] : memref<1x2048xf32, #tpu.memory_space<vmem>>, vector<1x2048xf32>
    %cst = arith.constant 2.500000e-01 : f32
    %1 = vector.broadcast %cst : f32 to vector<1x2048xf32>
    %2 = arith.subf %0, %1 : vector<1x2048xf32>
    %cst_1 = arith.constant -1.500000e+00 : f32
    %3 = vector.broadcast %cst_1 : f32 to vector<1x2048xf32>
    %4 = arith.mulf %3, %2 : vector<1x2048xf32>
    %5 = math.exp %4 : vector<1x2048xf32>
    %cst_2 = arith.constant 1.000000e+00 : f32
    %6 = vector.broadcast %cst_2 : f32 to vector<1x2048xf32>
    %7 = arith.addf %6, %5 : vector<1x2048xf32>
    %cst_3 = arith.constant 1.000000e+00 : f32
    %8 = vector.broadcast %cst_3 : f32 to vector<1x2048xf32>
    %9 = arith.divf %8, %7 : vector<1x2048xf32>
    %c0_4 = arith.constant 0 : index
    %c0_5 = arith.constant 0 : index
    %10 = vector.load %arg2[%c0_4, %c0_5] : memref<1x2048xf32, #tpu.memory_space<vmem>>, vector<1x2048xf32>
    tpu.vector_store %arg2[%c0_4, %c0_5], %9 {strides = array<i32>} : memref<1x2048xf32, #tpu.memory_space<vmem>>, vector<1x2048xf32>,
    return
  }
  func.func @transform_0(%arg0: i32) -> (i32, i32) {
    %c0_i32 = arith.constant 0 : i32
    %c0_i32_0 = arith.constant 0 : i32
    return %arg0, %c0_i32 : i32, i32
  }
  func.func @transform_1(%arg0: i32) -> (i32, i32) {
    %c0_i32 = arith.constant 0 : i32
    %c0_i32_0 = arith.constant 0 : i32
    return %arg0, %c0_i32 : i32, i32
  }
}

</mosaic_0001>

<bundles_post_ra>
// kernel: tpu_custom_call.1
= control target key start
LH: loop header
LB: loop body
LE: loop exit
PB: predicated region body
PF: predicated region fallthrough
CT: control target
= control target key end

     0   :  { %6 = vsyncpa [#allocation3], 0  ;;  %s150_s0 = inlined_call_operand.hbm [shape: f32[1,2048], index: 0, kind: input, shape index: {}]   ;;  %s151_s1 = inlined_call_operand.hbm [shape: f32[1,2048], index: 1, kind: output, shape index: {}]  }
   0x1   :  { %7 = vsyncpa [#allocation4], 0  ;;  %s114_s6 = smov [#allocation2]   ;;  %s66_s10 = scalar_lea.hbm %s150_s0, 256 }
   0x2   :  { %s14_s7 = sshll.u32 %s114_s6, 4  ;;  %p67_p0 = scmp.ne.s32.totalorder %s150_s0, %s66_s10  ;;  %s15_s7 = int_to_ptr.vmem [resolvable:$true] %s14_s7 }
   0x3   :  { %p70_p1 = scmp.lt.u32.totalorder %s66_s10, %s150_s0 }
   0x5   :  { %p72_p2 = pnand %p70_p1, %p67_p0 }
   0x7   :  { %75 = shalt.err (!%p72_p2)
}
   0x8   :  { %s76_s15 = scalar_lea.vmem %s15_s7, 256  ;;  %p81_p4 = scmp.lt.s32.totalorder %s15_s7, %s15_s7 }
   0x9   :  { %p77_p3 = scmp.ne.s32.totalorder %s15_s7, %s76_s15  ;;  %p82_p5 = scmp.lt.s32.totalorder %s76_s15, %s76_s15 }
   0xb   :  { %p83_p6 = por %p82_p5, %p81_p4 }
   0xd   :  { %p84_p7 = pnand %p83_p6, %p77_p3 }
   0xf   :  { %87 = shalt.err (!%p84_p7)
}
  0x10   :  { %17 = dma.hbm_to_vmem [thread:$0]  %s150_s0, 256, %s15_s7, [#allocation3]  }
  0x11   :  { %110 = dma.done.wait [#allocation3], 256  }
  0x12   :  { %111 = vsyncadd [#allocation3], 4294967040  ;;  %v21_v0 = vld [vmem:[#allocation2] sm:$0xff]  ;;  %v22_v1 = vld [vmem:[#allocation2 + $0x8] sm:$0xff]  ;;  %s115_s18 = smov [#allocation5]  }
  0x13   :  { %v54_v2 = vadd.f32 -0.25, %v21_v0  ;;  %v55_v3 = vadd.f32 -0.25, %v22_v1  ;;  %s45_s0 = sshll.u32 %s115_s18, 4  ;;  %s46_s0 = int_to_ptr.vmem [resolvable:$true] %s45_s0 }
  0x14   :  { %s88_s19 = scalar_lea.vmem %s46_s0, 256  ;;  %p93_p9 = scmp.lt.s32.totalorder %s46_s0, %s46_s0 }
  0x15   :  { %v25_v4 = vmul.f32 -1.5, %v54_v2  ;;  %v26_v5 = vmul.f32 -1.5, %v55_v3  ;;  %p89_p8 = scmp.ne.s32.totalorder %s46_s0, %s88_s19  ;;  %p94_p10 = scmp.lt.s32.totalorder %s88_s19, %s88_s19 }
  0x17   :  { %v27_v6 = vmul.f32 1.442695, %v25_v4  ;;  %v29_v7 = vmul.f32 1.442695, %v26_v5  ;;  %p95_p11 = por %p94_p10, %p93_p9 }
  0x19   :  { %58 = vpow2.f32 %v27_v6  ;;  %p96_p12 = pnand %p95_p11, %p89_p8 }
  0x1a   :  { %60 = vpow2.f32 %v29_v7 }
  0x23   :  { %v59_v8 = vpop.eup %58 }
  0x24   :  { %v61_v9 = vpop.eup %60  ;;  %v31_v10 = vadd.f32 1.0, %v59_v8 }
  0x25   :  { %v32_v11 = vadd.f32 1.0, %v61_v9 }
  0x26   :  { %62 = vrcp.f32 %v31_v10 }
  0x27   :  { %64 = vrcp.f32 %v32_v11 }
  0x30   :  { %v63_v12 = vpop.eup %62 }
  0x31   :  { %v65_v13 = vpop.eup %64  ;;  %37 = vst [vmem:[#allocation5] sm:$0xff] %v63_v12 }
  0x32   :  { %38 = vst [vmem:[#allocation5 + $0x8] sm:$0xff] %v65_v13 }
  0x33   :  { %99 = shalt.err (!%p96_p12)
}
  0x34   :  { %s100_s22 = scalar_lea.hbm %s151_s1, 256 }
  0x35   :  { %p101_p13 = scmp.ne.s32.totalorder %s151_s1, %s100_s22  ;;  %p104_p0 = scmp.lt.u32.totalorder %s100_s22, %s151_s1 }
  0x37   :  { %p106_p1 = pnand %p104_p0, %p101_p13 }
  0x39   :  { %109 = shalt.err (!%p106_p1)
}
  0x3a   :  { %48 = dma.vmem_to_hbm [thread:$0]  %s46_s0, 256, %s151_s1, [#allocation4]  }
  0x3b   :  { %112 = dma.done.wait [#allocation4], 256  }
  0x3c   :  { %113 = vsyncadd [#allocation4], 4294967040 }
  0x3d   :  { %52 = vsyncpa [#allocation3], 1 }
  0x3e   :  { %53 = vsyncpa [#allocation4], 1 }

</bundles_post_ra>
